<compile_context>
chip_gen: v6e
topology: v6e:2x2x1
jax: 0.10.0
libtpu: 0.0.40
codegen_flags: <defaults>
</compile_context>

<pallas_src>
import jax
import jax.numpy as jnp
from jax.experimental import pallas as pl
from jax.experimental.pallas import tpu as pltpu


# ----------------------------- small helpers --------------------------------

def _round_up(x, m):
    return (x + m - 1) // m * m


def _cdiv(a, b):
    return (a + b - 1) // b


def _tpu_vmem_budget():
    """~82% of physical VMEM, capped at 100 MiB (leaves Mosaic scratch headroom).

    128 MiB parts (v5e/v6e) -> ~100 MiB; 64 MiB parts (v7x) -> ~52 MiB.
    """
    try:
        cap = int(pltpu.get_tpu_info().vmem_capacity_bytes)
    except Exception:
        cap = 64 << 20  # conservative default (v7x per-core VMEM)
    return min(int(cap * 0.82), 100 << 20)


def _resident_vmem(tm, E_p, H_p, cbytes, obytes):
    """VMEM working set (bytes) of the weights-resident path at row tile tm."""
    return (2 * tm * E_p * cbytes          # x row tile (double buffered)
            + 2 * tm * E_p * obytes        # out row tile
            + 2 * 2 * E_p * H_p * cbytes   # W1 + W2 (allocated double buffered)
            + 2 * (H_p + E_p) * 4          # biases
            + tm * H_p * 4                 # h intermediate (f32)
            + tm * E_p * 4)                # y intermediate (f32)


def _stream_vmem(tm, E_p, th, cbytes, obytes, use_scratch):
    """VMEM working set (bytes) of the hidden-streaming path at row tile tm."""
    v = (2 * tm * E_p * cbytes             # x row tile (double buffered)
         + 2 * tm * E_p * obytes           # out row tile
         + 2 * E_p * th * cbytes           # W1 chunk stream (double buffered)
         + 2 * th * E_p * cbytes           # W2 chunk stream (double buffered)
         + 2 * (th + E_p) * 4              # biases
         + tm * th * 4)                    # h intermediate (f32)
    if use_scratch:
        v += tm * E_p * 4                  # f32 accumulator scratch
    return v


# -------------------------------- kernels ------------------------------------

def ffn_resident_kernel(x_ref, w1_ref, b1_ref, w2_ref, b2_ref, o_ref):
    """Whole W1/W2 resident in VMEM (constant block index); grid = row tiles only."""
    h = jnp.dot(x_ref[...], w1_ref[...], preferred_element_type=jnp.float32)
    h = jnp.maximum(h + b1_ref[...], 0.0)
    y = jnp.dot(h.astype(w2_ref.dtype), w2_ref[...],
                preferred_element_type=jnp.float32)
    o_ref[...] = (y + b2_ref[...]).astype(o_ref.dtype)


def ffn_stream_kernel_accout(x_ref, w1_ref, b1_ref, w2_ref, b2_ref, o_ref):
    """Hidden-streaming path, f32 output: accumulate directly into o_ref (block
    index constant across k => resident for the whole k loop; no scratch)."""
    k = pl.program_id(1)

    @pl.when(k == 0)
    def _init():
        o_ref[...] = jnp.broadcast_to(b2_ref[...], o_ref.shape)

    h = jnp.dot(x_ref[...], w1_ref[...], preferred_element_type=jnp.float32)
    h = jnp.maximum(h + b1_ref[...], 0.0)
    o_ref[...] += jnp.dot(h.astype(w2_ref.dtype), w2_ref[...],
                          preferred_element_type=jnp.float32)


def ffn_stream_kernel_scratch(x_ref, w1_ref, b1_ref, w2_ref, b2_ref, o_ref,
                              acc_ref):
    """Hidden-streaming path, non-f32 output: f32 VMEM accumulator scratch."""
    k = pl.program_id(1)

    @pl.when(k == 0)
    def _init():
        acc_ref[...] = jnp.broadcast_to(b2_ref[...], acc_ref.shape)

    h = jnp.dot(x_ref[...], w1_ref[...], preferred_element_type=jnp.float32)
    h = jnp.maximum(h + b1_ref[...], 0.0)
    acc_ref[...] += jnp.dot(h.astype(w2_ref.dtype), w2_ref[...],
                            preferred_element_type=jnp.float32)

    @pl.when(k == pl.num_programs(1) - 1)
    def _finalize():
        o_ref[...] = acc_ref[...].astype(o_ref.dtype)


# ------------------------------- wrappers ------------------------------------

def prepare_ffn_params(w1, b1, w2, b2, *, compute_dtype=jnp.bfloat16,
                       hidden_chunk=None, force_stream=False):
    """Pad/cast the weights ONCE (hoisted out of the per-call hot path) and pick
    the execution mode: weights-resident fast path vs. hidden-chunk streaming."""
    E, H = w1.shape
    assert w2.shape == (H, E) and b1.shape == (H,) and b2.shape == (E,)
    cbytes = jnp.dtype(compute_dtype).itemsize
    E_p = _round_up(E, 128)
    H_p = _round_up(H, 128)
    vmem_budget = _tpu_vmem_budget()

    # Weights-resident fast path (checked against the smallest row tile; the
    # actual tm is finalized per call and only adds row-tile bytes).
    resident_ok = (not force_stream) and (
        _resident_vmem(128, E_p, H_p, cbytes, 4) <= vmem_budget)

    if resident_ok:
        if (E_p, H_p) != (E, H):
            w1_p = jnp.pad(w1, ((0, E_p - E), (0, H_p - H)))
            w2_p = jnp.pad(w2, ((0, H_p - H), (0, E_p - E)))
        else:
            w1_p, w2_p = w1, w2
        w1_p = w1_p.astype(compute_dtype)
        w2_p = w2_p.astype(compute_dtype)
        b1_p = jnp.pad(b1, (0, H_p - H)).reshape(1, H_p).astype(jnp.float32)
        b2_p = jnp.pad(b2, (0, E_p - E)).reshape(1, E_p).astype(jnp.float32)
        return dict(mode="resident", E=E, H=H, E_p=E_p, H_p=H_p, th=None,
                    w1=w1_p, b1=b1_p, w2=w2_p, b2=b2_p,
                    compute_dtype=compute_dtype, vmem_budget=vmem_budget)

    # Streaming path: pick th first, then pad H up to a multiple of th (avoids
    # degenerate th=128 grids when H has no 128-multiple divisor <= cap).
    th = hidden_chunk if hidden_chunk is not None else min(512, _round_up(H, 128))
    th = _round_up(int(th), 128)
    H_p = _round_up(H, th)
    nk = H_p // th

    # W1 stored chunk-major (nk, E_p, th): every streamed chunk is one
    # contiguous DMA (W2's (th, E_p) chunks are contiguous already).
    w1_p = jnp.pad(w1, ((0, E_p - E), (0, H_p - H))).astype(compute_dtype)
    w1_c = w1_p.reshape(E_p, nk, th).transpose(1, 0, 2)
    w2_p = jnp.pad(w2, ((0, H_p - H), (0, E_p - E))).astype(compute_dtype)
    b1_p = jnp.pad(b1, (0, H_p - H)).reshape(1, H_p).astype(jnp.float32)
    b2_p = jnp.pad(b2, (0, E_p - E)).reshape(1, E_p).astype(jnp.float32)
    return dict(mode="stream", E=E, H=H, E_p=E_p, H_p=H_p, th=th,
                w1=w1_c, b1=b1_p, w2=w2_p, b2=b2_p,
                compute_dtype=compute_dtype, vmem_budget=vmem_budget)


def feed_forward_prepared(x, params, *, tm=None):
    """relu(x @ W1 + b1) @ W2 + b2 with pre-prepared (padded/cast) weights."""
    B, T, E = x.shape
    assert E == params["E"]
    E_p, H_p, th = params["E_p"], params["H_p"], params["th"]
    compute_dtype = params["compute_dtype"]
    vmem_budget = params["vmem_budget"]
    out_dtype = x.dtype
    cbytes = jnp.dtype(compute_dtype).itemsize
    obytes = jnp.dtype(out_dtype).itemsize
    M = B * T
    stream = params["mode"] == "stream"

    # Row tile: generation-aware target, >= 2 grid steps (v7x megacore), shrunk
    # until the working set fits the per-generation VMEM budget.
    if tm is None:
        tm_target = 512 if vmem_budget > (60 << 20) else 384
        tm = min(tm_target, _round_up(max(_cdiv(M, 2), 8), 8))
    tm = max(8, _round_up(int(tm), 8))

    if stream:
        use_scratch = out_dtype != jnp.float32
        vmem_fn = lambda t: _stream_vmem(t, E_p, th, cbytes, obytes, use_scratch)
    else:
        vmem_fn = lambda t: _resident_vmem(t, E_p, H_p, cbytes, obytes)
    while tm > 8 and vmem_fn(tm) > vmem_budget:
        tm = max(8, _round_up(tm // 2, 8))

    M_p = _round_up(M, tm)
    n_row = M_p // tm

    x2 = x.reshape(M, E)
    if (M_p, E_p) != (M, E):
        x2 = jnp.pad(x2, ((0, M_p - M), (0, E_p - E)))
    x2 = x2.astype(compute_dtype)

    vmem_needed = vmem_fn(tm)
    vmem_limit = int(min(max(int(vmem_needed * 1.25), 32 << 20), vmem_budget))

    # Cost estimate: weights are re-read once per row tile in streaming mode,
    # exactly once in resident mode.
    w_bytes = (n_row if stream else 1) * 2 * E_p * H_p * cbytes
    cost = pl.CostEstimate(
        flops=4 * M_p * E_p * H_p,
        transcendentals=0,
        bytes_accessed=M_p * E_p * (cbytes + obytes) + w_bytes + (H_p + E_p) * 4)

    if not stream:
        out2 = pl.pallas_call(
            ffn_resident_kernel,
            out_shape=jax.ShapeDtypeStruct((M_p, E_p), out_dtype),
            grid_spec=pltpu.PrefetchScalarGridSpec(
                num_scalar_prefetch=0,
                grid=(n_row,),
                in_specs=[
                    pl.BlockSpec((tm, E_p), lambda i: (i, 0)),      # x row tile
                    pl.BlockSpec((E_p, H_p), lambda i: (0, 0)),     # whole W1 (fetched once)
                    pl.BlockSpec((1, H_p), lambda i: (0, 0)),       # b1
                    pl.BlockSpec((H_p, E_p), lambda i: (0, 0)),     # whole W2 (fetched once)
                    pl.BlockSpec((1, E_p), lambda i: (0, 0)),       # b2
                ],
                out_specs=pl.BlockSpec((tm, E_p), lambda i: (i, 0)),
            ),
            compiler_params=pltpu.CompilerParams(
                dimension_semantics=("parallel",),
                vmem_limit_bytes=vmem_limit),
            cost_estimate=cost,
        )(x2, params["w1"], params["b1"], params["w2"], params["b2"])
    else:
        nk = H_p // th
        kernel = ffn_stream_kernel_scratch if use_scratch else ffn_stream_kernel_accout
        scratch = [pltpu.VMEM((tm, E_p), jnp.float32)] if use_scratch else []
        out2 = pl.pallas_call(
            kernel,
            out_shape=jax.ShapeDtypeStruct((M_p, E_p), out_dtype),
            grid_spec=pltpu.PrefetchScalarGridSpec(
                num_scalar_prefetch=0,
                grid=(n_row, nk),
                in_specs=[
                    pl.BlockSpec((tm, E_p), lambda i, k: (i, 0)),        # x rows (reused over k)
                    pl.BlockSpec((None, E_p, th), lambda i, k: (k, 0, 0)),  # W1 chunk (contiguous)
                    pl.BlockSpec((1, th), lambda i, k: (0, k)),          # b1 chunk
                    pl.BlockSpec((th, E_p), lambda i, k: (k, 0)),        # W2 chunk (contiguous)
                    pl.BlockSpec((1, E_p), lambda i, k: (0, 0)),         # b2 (constant)
                ],
                out_specs=pl.BlockSpec((tm, E_p), lambda i, k: (i, 0)),
                scratch_shapes=scratch,
            ),
            compiler_params=pltpu.CompilerParams(
                dimension_semantics=("parallel", "arbitrary"),
                vmem_limit_bytes=vmem_limit),
            cost_estimate=cost,
        )(x2, params["w1"], params["b1"], params["w2"], params["b2"])

    if (M_p, E_p) != (M, E):
        out2 = out2[:M, :E]
    return out2.reshape(B, T, E)


def feed_forward(x, w1, b1, w2, b2, *, params=None, tm=None,
                 hidden_chunk=None, force_stream=False,
                 compute_dtype=jnp.bfloat16):
    """Convenience wrapper.  For hot loops, call prepare_ffn_params once and
    reuse the returned params (pad/cast of the weights is hoisted there)."""
    if params is None:
        params = prepare_ffn_params(w1, b1, w2, b2, compute_dtype=compute_dtype,
                                    hidden_chunk=hidden_chunk,
                                    force_stream=force_stream)
    return feed_forward_prepared(x, params, tm=tm)


def init_params(key, n_embd, n_hidden, dtype=jnp.float32):
    """Deterministic init matching nn.Linear's U(-1/sqrt(fan_in), 1/sqrt(fan_in))."""
    k1, k2, k3, k4 = jax.random.split(key, 4)
    lim1 = 1.0 / (n_embd ** 0.5)
    lim2 = 1.0 / (n_hidden ** 0.5)
    w1 = jax.random.uniform(k1, (n_embd, n_hidden), dtype, -lim1, lim1)
    b1 = jax.random.uniform(k2, (n_hidden,), dtype, -lim1, lim1)
    w2 = jax.random.uniform(k3, (n_hidden, n_embd), dtype, -lim2, lim2)
    b2 = jax.random.uniform(k4, (n_embd,), dtype, -lim2, lim2)
    return w1, b1, w2, b2


if __name__ == "__main__":
    # Test 1: default path (weights-resident fast path at these sizes).
    B, T, n_embd, n_hidden = 2, 8, 32, 64
    key = jax.random.PRNGKey(0)
    kx, kp = jax.random.split(key)
    x = jax.random.normal(kx, (B, T, n_embd), jnp.float32)
    w1, b1, w2, b2 = init_params(kp, n_embd, n_hidden)

    params = prepare_ffn_params(w1, b1, w2, b2)   # pad/cast hoisted out of hot path
    out = jax.block_until_ready(feed_forward(x, w1, b1, w2, b2, params=params))
    ref = jnp.maximum(x @ w1 + b1, 0.0) @ w2 + b2
    assert out.shape == (B, T, n_embd)
    assert jnp.allclose(out, ref, atol=2e-2, rtol=2e-2), \
        float(jnp.max(jnp.abs(out - ref)))

    # Test 2: hidden-streaming path forced (2 hidden chunks, E/H padding), f32
    # output accumulated directly in the resident o_ref block.
    B2, T2, E2, H2 = 2, 8, 48, 200
    x2 = jax.random.normal(jax.random.PRNGKey(1), (B2, T2, E2), jnp.float32)
    w1b, b1b, w2b, b2b = init_params(jax.random.PRNGKey(2), E2, H2)
    ref2 = jnp.maximum(x2 @ w1b + b1b, 0.0) @ w2b + b2b
    out2 = jax.block_until_ready(
        feed_forward(x2, w1b, b1b, w2b, b2b, force_stream=True, hidden_chunk=128))
    assert out2.shape == (B2, T2, E2)
    assert jnp.allclose(out2, ref2, atol=3e-2, rtol=3e-2), \
        float(jnp.max(jnp.abs(out2 - ref2)))

    # Test 3: streaming path with bf16 output (exercises the f32 scratch accumulator).
    out3 = jax.block_until_ready(
        feed_forward(x2.astype(jnp.bfloat16), w1b, b1b, w2b, b2b,
                     force_stream=True, hidden_chunk=128))
    assert out3.dtype == jnp.bfloat16
    assert jnp.allclose(out3.astype(jnp.float32), ref2, atol=1e-1, rtol=1e-1), \
        float(jnp.max(jnp.abs(out3.astype(jnp.float32) - ref2)))

    print("KERNEL_OK")
</pallas_src>

<mosaic_0001>
module attributes {stable_mosaic.version = 11 : i64} {
  func.func @ffn_resident_kernel(%arg0: i32, %arg1: memref<8x128xbf16, #tpu.memory_space<vmem>>, %arg2: memref<128x128xbf16, #tpu.memory_space<vmem>>, %arg3: memref<1x128xf32, #tpu.memory_space<vmem>>, %arg4: memref<128x128xbf16, #tpu.memory_space<vmem>>, %arg5: memref<1x128xf32, #tpu.memory_space<vmem>>, %arg6: memref<8x128xf32, #tpu.memory_space<vmem>>) attributes {dimension_semantics = [#tpu.dimension_semantics<parallel>], iteration_bounds = array<i64: 2>, scalar_prefetch = 0 : i64, scratch_operands = 0 : i64, tpu.core_type = #tpu.core_type<tc>, window_params = [{transform_indices = @transform_0, window_bounds = array<i64: 8, 128>}, {pipeline_mode = #tpu.pipeline_mode<synchronous>, transform_indices = @transform_1, window_bounds = array<i64: 128, 128>}, {pipeline_mode = #tpu.pipeline_mode<synchronous>, transform_indices = @transform_2, window_bounds = array<i64: 1, 128>}, {pipeline_mode = #tpu.pipeline_mode<synchronous>, transform_indices = @transform_3, window_bounds = array<i64: 128, 128>}, {pipeline_mode = #tpu.pipeline_mode<synchronous>, transform_indices = @transform_4, window_bounds = array<i64: 1, 128>}, {transform_indices = @transform_5, window_bounds = array<i64: 8, 128>}]} {
    %c0 = arith.constant 0 : index
    %c0_0 = arith.constant 0 : index
    %0 = vector.load %arg1[%c0, %c0_0] : memref<8x128xbf16, #tpu.memory_space<vmem>>, vector<8x128xbf16>
    %c0_1 = arith.constant 0 : index
    %c0_2 = arith.constant 0 : index
    %1 = vector.load %arg2[%c0_1, %c0_2] : memref<128x128xbf16, #tpu.memory_space<vmem>>, vector<128x128xbf16>
    %cst = arith.constant dense<0.000000e+00> : vector<8x128xf32>
    %2 = tpu.matmul %0, %1, %cst {dimension_numbers = #tpu.dot_dimension_numbers<[1], [0], [0], [1], [0, 0, 1, 1], [], []>} : vector<8x128xbf16>, vector<128x128xbf16>, vector<8x128xf32> -> vector<8x128xf32>
    %c0_3 = arith.constant 0 : index
    %c0_4 = arith.constant 0 : index
    %3 = vector.load %arg3[%c0_3, %c0_4] : memref<1x128xf32, #tpu.memory_space<vmem>>, vector<1x128xf32>
    %4 = vector.broadcast %3 : vector<1x128xf32> to vector<8x128xf32>
    %5 = arith.addf %2, %4 : vector<8x128xf32>
    %cst_5 = arith.constant 0.000000e+00 : f32
    %6 = vector.broadcast %cst_5 : f32 to vector<8x128xf32>
    %7 = arith.maximumf %5, %6 : vector<8x128xf32>
    %8 = arith.truncf %7 : vector<8x128xf32> to vector<8x128xbf16>
    %c0_6 = arith.constant 0 : index
    %c0_7 = arith.constant 0 : index
    %9 = vector.load %arg4[%c0_6, %c0_7] : memref<128x128xbf16, #tpu.memory_space<vmem>>, vector<128x128xbf16>
    %cst_8 = arith.constant dense<0.000000e+00> : vector<8x128xf32>
    %10 = tpu.matmul %8, %9, %cst_8 {dimension_numbers = #tpu.dot_dimension_numbers<[1], [0], [0], [1], [0, 0, 1, 1], [], []>} : vector<8x128xbf16>, vector<128x128xbf16>, vector<8x128xf32> -> vector<8x128xf32>
    %c0_9 = arith.constant 0 : index
    %c0_10 = arith.constant 0 : index
    %11 = vector.load %arg5[%c0_9, %c0_10] : memref<1x128xf32, #tpu.memory_space<vmem>>, vector<1x128xf32>
    %12 = vector.broadcast %11 : vector<1x128xf32> to vector<8x128xf32>
    %13 = arith.addf %10, %12 : vector<8x128xf32>
    %c0_11 = arith.constant 0 : index
    %c0_12 = arith.constant 0 : index
    %14 = vector.load %arg6[%c0_11, %c0_12] : memref<8x128xf32, #tpu.memory_space<vmem>>, vector<8x128xf32>
    tpu.vector_store %arg6[%c0_11, %c0_12], %13 {strides = array<i32>} : memref<8x128xf32, #tpu.memory_space<vmem>>, vector<8x128xf32>,
    return
  }
  func.func @transform_0(%arg0: i32) -> (i32, i32) {
    %c0_i32 = arith.constant 0 : i32
    %c0_i32_0 = arith.constant 0 : i32
    return %arg0, %c0_i32 : i32, i32
  }
  func.func @transform_1(%arg0: i32) -> (i32, i32) {
    %c0_i32 = arith.constant 0 : i32
    %c0_i32_0 = arith.constant 0 : i32
    %c0_i32_1 = arith.constant 0 : i32
    return %c0_i32, %c0_i32_0 : i32, i32
  }
  func.func @transform_2(%arg0: i32) -> (i32, i32) {
    %c0_i32 = arith.constant 0 : i32
    %c0_i32_0 = arith.constant 0 : i32
    %c0_i32_1 = arith.constant 0 : i32
    return %c0_i32, %c0_i32_0 : i32, i32
  }
  func.func @transform_3(%arg0: i32) -> (i32, i32) {
    %c0_i32 = arith.constant 0 : i32
    %c0_i32_0 = arith.constant 0 : i32
    %c0_i32_1 = arith.constant 0 : i32
    return %c0_i32, %c0_i32_0 : i32, i32
  }
  func.func @transform_4(%arg0: i32) -> (i32, i32) {
    %c0_i32 = arith.constant 0 : i32
    %c0_i32_0 = arith.constant 0 : i32
    %c0_i32_1 = arith.constant 0 : i32
    return %c0_i32, %c0_i32_0 : i32, i32
  }
  func.func @transform_5(%arg0: i32) -> (i32, i32) {
    %c0_i32 = arith.constant 0 : i32
    %c0_i32_0 = arith.constant 0 : i32
    return %arg0, %c0_i32 : i32, i32
  }
}

</mosaic_0001>

<bundles_post_ra>
// kernel: tpu_custom_call.1
= control target key start
LH: loop header
LB: loop body
LE: loop exit
PB: predicated region body
PF: predicated region fallthrough
CT: control target
= control target key end

     0   :  { %10 = vsyncpa [#allocation3], 0  ;;  %s1153_s0 = inlined_call_operand.hbm [shape: bf16[16,128], index: 0, kind: input, shape index: {}]   ;;  %s1154_s1 = inlined_call_operand.hbm [shape: bf16[128,128], index: 1, kind: input, shape index: {}]   ;;  %s1155_s2 = inlined_call_operand.vmem [shape: f32[1,128], index: 2, kind: input, shape index: {}]   ;;  %s1156_s3 = inlined_call_operand.hbm [shape: bf16[128,128], index: 3, kind: input, shape index: {}]   ;;  %s1157_s4 = inlined_call_operand.vmem [shape: f32[1,128], index: 4, kind: input, shape index: {}]   ;;  %s1158_s5 = inlined_call_operand.hbm [shape: f32[16,128], index: 5, kind: output, shape index: {}]  }
   0x1   :  { %12 = vsyncpa [#allocation3 + $0x1], 0 }
   0x2   :  { %13 = vsyncpa [#allocation6], 0 }
   0x3   :  { %14 = vsyncpa [#allocation4], 0 }
   0x4   :  { %16 = vsyncpa [#allocation4 + $0x1], 0  ;;  %s966_s18 = smov 0   ;;  %s968_s19 = smov 0  }
   0x5   :  { %s970_s20 = smov 0   ;;  %s972_s21 = smov 0  }
   0x6 LB: > { %s987_s22 = sadd.s32 4294967295, %s926_s21   ;;  %s599_s23 = sadd.s32 4294967294, %s926_s21   ;;  %s926_s21 = sphi %s972_s21, %s1180_s21   ;;  %s922_s20 = sphi %s970_s20, %s1179_s20   ;;  %s918_s19 = sphi %s968_s19, %s1178_s19   ;;  %s914_s18 = sphi %s966_s18, %s1177_s18  }
   0x7   : > { %p42_p0 = scmp.ne.s32.totalorder %s918_s19, %s914_s18  ;;  %p1159_p1 = scmp.eq.s32.totalorder %s987_s22, 0 }
   0x8   : > { %p156_p3 = scmp.eq.s32.totalorder %s599_s23, 1  ;;  %p600_p5 = scmp.ge.s32.totalorder %s926_s21, 1 }
   0x9   : > { %p996_p4 = por %p1159_p1, %p42_p0  ;;  %p163_p7 = scmp.lt.s32.totalorder %s926_s21, 3 }
   0xa   : > { %p1001_p6 = por %p156_p3, %p42_p0  ;;  %s928_s27 = smov [#allocation5]  }
   0xb   : > { %s1163_s24 = scalar_select %p996_p4, 1, 0 }
   0xc   : > { %s1164_s25 = scalar_select %p1001_p6, 1, 0 }
   0xd   : > { %p1006_p8 = pnand %p600_p5, %p163_p7  ;;  %s175_s28 = sshll.u32 %s928_s27, 4  ;;  %s176_s28 = int_to_ptr.vmem [resolvable:$true] %s175_s28 }
   0xe   : > { %s929_s30 = smov [#allocation7]   ;;  %s789_s7 = scalar_lea.vmem %s176_s28, 1024 }
   0xf   : > { %s1165_s26 = scalar_select %p1006_p8, 1, 0 }
  0x10   : > { %p703_p9 = pneg %p1006_p8  ;;  %s191_s6 = sshll.u32 %s929_s30, 4  ;;  %s192_s6 = int_to_ptr.vmem [resolvable:$true] %s191_s6 }
  0x11   : > { %p790_p13 = scmp.ne.s32.totalorder %s176_s28, %s789_s7  ;;  %p797_p5 = scmp.lt.s32.totalorder %s176_s28, %s176_s28 }
  0x12   : > { %p1015_p11 = pnand %p703_p9, %p1159_p1  ;;  %p798_p7 = scmp.lt.s32.totalorder %s789_s7, %s789_s7 }
  0x14   : > { %p780_p12 = pneg %p1015_p11  ;;  %p799_p10 = por %p798_p7, %p797_p5 }
  0x16   : > { %p792_p0 = pnand %p790_p13, %p780_p12 }
  0x18   : > { %p793_p3 = pneg %p792_p0 }
  0x1a   : > { %p800_p9 = pnand %p799_p10, %p793_p3 }
  0x1c   : > { %803 = shalt.err (!%p800_p9)
}
  0x1d   : > { %s930_s8 = smov 64   ;;  %s931_s9 = smov 4  }
  0x1e   : > { %706 = dma.hbm_to_vmem [thread:$0]  (!%p1015_p11), %s1154_s1, 1024, %s176_s28, [#allocation6], %s930_s8, %s930_s8, %s931_s9  }
  0x1f   : > { %s815_s12 = scalar_lea.vmem %s192_s6, 1024  ;;  %p823_p2 = scmp.lt.s32.totalorder %s192_s6, %s192_s6 }
  0x20   : > { %p816_p1 = scmp.ne.s32.totalorder %s192_s6, %s815_s12  ;;  %p824_p6 = scmp.lt.s32.totalorder %s815_s12, %s815_s12 }
  0x22   : > { %p818_p13 = pnand %p816_p1, %p780_p12  ;;  %p825_p5 = por %p824_p6, %p823_p2 }
  0x24   : > { %p819_p0 = pneg %p818_p13 }
  0x26   : > { %p826_p10 = pnand %p825_p5, %p819_p0 }
  0x28   : > { %829 = shalt.err (!%p826_p10)
}
  0x29   : > { %709 = dma.hbm_to_vmem [thread:$0]  (!%p1015_p11), %s1156_s3, 1024, %s192_s6, [#allocation6], %s930_s8, %s930_s8, %s931_s9  }
  0x2a   : > { %s1038_s15 = sadd.s32 1, %s926_s21   ;;  %s29_s16 = sadd.s32 1, %s922_s20 }
  0x2b   : > { %s26_s17 = ssub.s32 %s926_s21, %s1038_s15  ;;  %p36_p1 = scmp.ne.s32.totalorder %s922_s20, %s918_s19 }
  0x2c   : > { %p27_p2 = scmp.eq.s32.totalorder %s26_s17, 0  ;;  %p37_p6 = scmp.eq.s32.totalorder %s926_s21, 0 }
  0x2d   : > { %p1167_p12 = scmp.eq.s32.totalorder %s987_s22, 1  ;;  %p720_p7 = scmp.lt.s32.totalorder %s926_s21, 2 }
  0x2e   : > { %s1054_s27 = scalar_select %p27_p2, %s922_s20, %s29_s16  }
  0x2f   : > { %p1048_p3 = por %p1167_p12, %p36_p1  ;;  %p38_p9 = por %p37_p6, %p36_p1 }
  0x30   : > { %s208_s28 = sand.u32 1, %s922_s20   ;;  %s605_s30 = sshll.u32 %s926_s21, 6 }
  0x31   : > { %s1168_s23 = scalar_select %p1048_p3, 1, 0 }
  0x32   : > { %s604_s29 = sshll.u32 %s208_s28, 2  ;;  %s1061_s8 = scalar_lea.hbm %s1153_s0, %s605_s30 }
  0x33   : > { %s212_s9 = scalar_lea.vmem [#allocation2], %s604_s29  ;;  %p1063_p11 = pnand %p720_p7, %p38_p9 }
  0x34   : > { %s219_s10 = sshll.u32 %s212_s9, 4  ;;  %s209_s12 = scalar_lea.sflag [#allocation3], %s208_s28  ;;  %s220_s10 = int_to_ptr.vmem [resolvable:$true] %s219_s10 }
  0x35   : > { %s830_s13 = scalar_lea.hbm %s1061_s8, 64  ;;  %p832_p0 = pneg %p1063_p11 }
  0x36   : > { %p831_p13 = scmp.ne.s32.totalorder %s1061_s8, %s830_s13  ;;  %s835_s17 = scalar_lea.hbm %s1153_s0, 128 }
  0x37   : > { %p836_p1 = scmp.lt.s32.totalorder %s1061_s8, %s1153_s0  ;;  %p837_p2 = scmp.lt.s32.totalorder %s835_s17, %s830_s13 }
  0x38   : > { %p833_p5 = pnand %p832_p0, %p831_p13 }
  0x39   : > { %p838_p6 = por %p837_p2, %p836_p1 }
  0x3a   : > { %p834_p10 = pneg %p833_p5 }
  0x3c   : > { %p839_p12 = pnand %p838_p6, %p834_p10 }
  0x3e   : > { %842 = shalt.err (!%p839_p12)
}
  0x3f   : > { %s843_s6 = scalar_lea.vmem %s220_s10, 64  ;;  %s932_s28 = smov [#allocation2]  }
  0x40   : > { %p844_p7 = scmp.ne.s32.totalorder %s220_s10, %s843_s6  ;;  %s848_s7 = sshll.u32 %s932_s28, 4  ;;  %s849_s7 = int_to_ptr.vmem [resolvable:$false] %s848_s7 }
  0x41   : > { %s850_s9 = scalar_lea.vmem %s849_s7, 128  ;;  %p851_p13 = scmp.lt.s32.totalorder %s220_s10, %s849_s7 }
  0x42   : > { %p846_p9 = pnand %p844_p7, %p832_p0  ;;  %p852_p5 = scmp.lt.s32.totalorder %s850_s9, %s843_s6 }
  0x44   : > { %p847_p3 = pneg %p846_p9  ;;  %p853_p4 = por %p852_p5, %p851_p13 }
  0x46   : > { %p854_p8 = pnand %p853_p4, %p847_p3 }
  0x48   : > { %857 = shalt.err (!%p854_p8)
}
  0x49   : > { %713 = dma.hbm_to_vmem [thread:$0]  (!%p1063_p11), %s1061_s8, 64, %s220_s10, %s209_s12  }
  0x4a   : > { %p1170_p10 = scmp.ne.s32.totalorder %s1165_s26, 0 }
  0x4b   : > { %s1084_s13 = sand.u32 (!%p1170_p10), 1, %s918_s19   ;;  %p1171_p0 = scmp.ne.s32.totalorder (!%p1170_p10), %s1163_s24, 0 }
  0x4c   : > { %228 = sbr.rel (%p1170_p10) target bundleno = 527 (0x20f), region = 40  ;;  %s607_s14 = sshll.u32 (!%p1170_p10), %s1084_s13, 2 }
  0x4d   : > { %s231_s16 = scalar_lea.sflag (!%p1170_p10), [#allocation3], %s1084_s13  ;;  %s1088_s17 = scalar_lea.vmem (!%p1170_p10), [#allocation2], %s607_s14 }
  0x51   : > { %901 = dma.done.wait (%p1171_p0), %s231_s16, 64  }
  0x52   : > { %903 = vsyncadd (%p1171_p0), %s231_s16, 4294967232  ;;  %p1172_p4 = scmp.eq.s32.totalorder %s987_s22, 0 }
  0x54   : > { %905 = dma.done.wait (%p1172_p4), [#allocation6], 2048   ;;  %p1173_p8 = pmov %p1172_p4 }
  0x55   : > { %v933_v0 = vmov 0.0   ;;  %vm934_vm0 = vmmov 0   ;;  %v762_v1 = vld [vmem:[#allocation5 + $0x38] sm:$0xff]   ;;  %v763_v2 = vld [vmem:[#allocation5 + $0x30] sm:$0xff]   ;;  %v764_v3 = vld [vmem:[#allocation5 + $0x28] sm:$0xff]   ;;  %s610_s8 = sshll.u32 %s1084_s13, 3 }
  0x56   : > { %907 = vsyncadd (%p1173_p8), [#allocation6], 4294965248  ;;  %651 = vmatprep.subr.bf16.mxu0 %v933_v0  ;;  %667 = vmatprep.mubr.msk.bf16.mxu0 %vm934_vm0, %v933_v0  ;;  %v770_v4 = vld [vmem:[#allocation7 + $0x38] sm:$0xff]   ;;  %v765_v5 = vld [vmem:[#allocation5 + $0x20] sm:$0xff]   ;;  %s630_s12 = sshll.u32 %s987_s22, 7  ;;  %s268_s30 = scalar_lea.vmem [#allocation8], %s610_s8 }
  0x57   : > { %671 = vmatprep.subr.bf16.mxu1 %v933_v0  ;;  %687 = vmatprep.mubr.msk.bf16.mxu1 %vm934_vm0, %v933_v0  ;;  %v771_v6 = vld [vmem:[#allocation7 + $0x30] sm:$0xff]   ;;  %v766_v7 = vld [vmem:[#allocation5 + $0x18] sm:$0xff]   ;;  %v772_v8 = vld [vmem:[#allocation7 + $0x28] sm:$0xff]   ;;  %s510_s29 = sshll.u32 %s268_s30, 4  ;;  %s1110_s7 = scalar_lea.hbm %s1158_s5, %s630_s12  ;;  %s1112_s29 = int_to_ptr.vmem [resolvable:$true] %s510_s29 }
  0x58   : > { %652 = vmatpush3.bf16.msra.mxu0 %v762_v1  ;;  %672 = vmatpush3.bf16.msra.mxu1 %v770_v4  ;;  %v767_v9 = vld [vmem:[#allocation5 + $0x10] sm:$0xff]   ;;  %v773_v10 = vld [vmem:[#allocation7 + $0x20] sm:$0xff]   ;;  %v768_v11 = vld [vmem:[#allocation5 + $0x8] sm:$0xff]   ;;  %s497_s9 = scalar_lea.sflag [#allocation4], %s1084_s13  ;;  %s858_s14 = scalar_lea.vmem %s1112_s29, 128 }
  0x59   : > { %653 = vmatprep.subr.bf16.mxu0 %v933_v0  ;;  %673 = vmatprep.subr.bf16.mxu1 %v933_v0  ;;  %v774_v12 = vld [vmem:[#allocation7 + $0x18] sm:$0xff]   ;;  %v769_v13 = vld [vmem:[#allocation5] sm:$0xff]   ;;  %v775_v14 = vld [vmem:[#allocation7 + $0x10] sm:$0xff]   ;;  %p859_p3 = scmp.ne.s32.totalorder %s1112_s29, %s858_s14  ;;  %p1174_p11 = scmp.ne.s32.totalorder %s1168_s23, 0 }
  0x5a   : > { %v270_v15 = vld [vmem:[%s1088_s17] sm:$0xf]  ;;  %v776_v16 = vld [vmem:[#allocation7 + $0x8] sm:$0xff]   ;;  %v777_v17 = vld [vmem:[#allocation7] sm:$0xff]   ;;  %s935_s22 = smov [#allocation8]  }
  0x5b   : > { %v611_v18 = vld [vmem:[%s1155_s2] ss:$0 sm:$0xff]  ;;  %p860_p1 = pnand %p859_p3, %p1174_p11  ;;  %s862_s16 = sshll.u32 %s935_s22, 4  ;;  %s863_s16 = int_to_ptr.vmem [resolvable:$false] %s862_s16 }
  0x5c   : > { %654 = vmatpush3.bf16.msra.mxu0 %v763_v2  ;;  %674 = vmatpush3.bf16.msra.mxu1 %v771_v6  ;;  %v620_v26 = vld [vmem:[%s1157_s4] ss:$0 sm:$0xff]  ;;  %s864_s17 = scalar_lea.vmem %s863_s16, 256  ;;  %p865_p6 = scmp.lt.s32.totalorder %s1112_s29, %s863_s16 }
  0x5d   : > { %655 = vmatprep.subr.bf16.mxu0 %v933_v0  ;;  %675 = vmatprep.subr.bf16.mxu1 %v933_v0  ;;  %p861_p2 = pneg %p860_p1  ;;  %p866_p12 = scmp.lt.s32.totalorder %s864_s17, %s858_s14 }
  0x5f   : > { %p867_p7 = por %p866_p12, %p865_p6 }
  0x60   : > { %656 = vmatpush3.bf16.msra.mxu0 %v764_v3  ;;  %676 = vmatpush3.bf16.msra.mxu1 %v772_v8 }
  0x61   : > { %657 = vmatprep.subr.bf16.mxu0 %v933_v0  ;;  %677 = vmatprep.subr.bf16.mxu1 %v933_v0  ;;  %p868_p9 = pnand %p867_p7, %p861_p2 }
  0x64   : > { %658 = vmatpush3.bf16.msra.mxu0 %v765_v5  ;;  %678 = vmatpush3.bf16.msra.mxu1 %v773_v10 }
  0x65   : > { %659 = vmatprep.subr.bf16.mxu0 %v933_v0  ;;  %679 = vmatprep.subr.bf16.mxu1 %v933_v0 }
  0x68   : > { %660 = vmatpush3.bf16.msra.mxu0 %v766_v7  ;;  %680 = vmatpush3.bf16.msra.mxu1 %v774_v12 }
  0x69   : > { %661 = vmatprep.subr.bf16.mxu0 %v933_v0  ;;  %681 = vmatprep.subr.bf16.mxu1 %v933_v0 }
  0x6c   : > { %662 = vmatpush3.bf16.msra.mxu0 %v767_v9  ;;  %682 = vmatpush3.bf16.msra.mxu1 %v775_v14 }
  0x6d   : > { %663 = vmatprep.subr.bf16.mxu0 %v933_v0  ;;  %683 = vmatprep.subr.bf16.mxu1 %v933_v0 }
  0x70   : > { %664 = vmatpush3.bf16.msra.mxu0 %v768_v11  ;;  %684 = vmatpush3.bf16.msra.mxu1 %v776_v16 }
  0x71   : > { %665 = vmatprep.subr.bf16.mxu0 %v933_v0  ;;  %685 = vmatprep.subr.bf16.mxu1 %v933_v0 }
  0x74   : > { %666 = vmatpush3.bf16.msra.mxu0 %v769_v13  ;;  %686 = vmatpush3.bf16.msra.mxu1 %v777_v17 }
  0x77   : > { %668 = vmatmul.mubr.bf16.vlgmr.msra.gmra.mxu0 %v270_v15 }
 0x137   : > { %v376_v19 = vpop.f32.mrf.mxu0 }
 0x138   : > { %v377_v20 = vadd.f32 %v611_v18, %v376_v19 }
 0x139   : > { %v669_v21 = vpop.f32.mrf.mxu0 }
 0x13a   : > { %v382_v22 = vmax.f32 %v377_v20, 0.0 }
 0x13b   : > { %v379_v23 = vpop.f32.mrf.mxu0 }
 0x13c   : > { %v383_v24 = vpack.c.bf16 %v382_v22, %v382_v22 }
 0x13d   : > { %v670_v25 = vpop.f32.mrf.mxu0 }
 0x13e   : > { %688 = vmatmul.mubr.bf16.vlgmr.msra.gmra.mxu1 %v383_v24 }
 0x1fe   : > { %v489_v27 = vpop.f32.mrf.mxu1 }
 0x1ff   : > { %v490_v28 = vadd.f32 %v620_v26, %v489_v27 }
 0x200   : > { %v689_v29 = vpop.f32.mrf.mxu1 }
 0x201   : > { %495 = vst [vmem:[%s268_s30] sm:$0xff] %v490_v28 }
 0x202   : > { %v492_v30 = vpop.f32.mrf.mxu1 }
 0x203   : > { %871 = shalt.err (!%p868_p9)
}
 0x204   : > { %s872_s24 = scalar_lea.hbm %s1110_s7, 128  ;;  %s876_s8 = scalar_lea.hbm %s1158_s5, 256 }
 0x205   : > { %p873_p13 = scmp.ne.s32.totalorder %s1110_s7, %s872_s24  ;;  %p877_p0 = scmp.lt.s32.totalorder %s1110_s7, %s1158_s5 }
 0x206   : > { %p878_p4 = scmp.lt.s32.totalorder %s876_s8, %s872_s24 }
 0x207   : > { %p874_p5 = pnand %p873_p13, %p1174_p11 }
 0x208   : > { %p879_p8 = por %p878_p4, %p877_p0 }
 0x209   : > { %p875_p10 = pneg %p874_p5 }
 0x20b   : > { %p880_p3 = pnand %p879_p8, %p875_p10 }
 0x20d   : > { %883 = shalt.err (!%p880_p3)
}
 0x20e   : > { %701 = dma.vmem_to_hbm [thread:$0]  (%p1174_p11), %s1112_s29, 128, %s1110_s7, %s497_s9   ;;  %v690_v31 = vpop.f32.mrf.mxu1 }
 0x20f PF: > { %s522_s12 = sand.u32 1, %s914_s18   ;;  %p1175_p1 = scmp.ne.s32.totalorder %s1164_s25, 0 }
 0x210   : > { %p1176_p2 = scmp.ge.s32.totalorder %s926_s21, 2  ;;  %s523_s30 = scalar_lea.sflag [#allocation4], %s522_s12 }
 0x212   : > { %p715_p6 = pnand %p1176_p2, %p1175_p1 }
 0x214   : > { %p716_p12 = pneg %p715_p6 }
 0x216   : > { %909 = dma.done.wait (%p716_p12), %s523_s30, 128  }
 0x217   : > { %911 = vsyncadd (%p716_p12), %s523_s30, 4294967168  ;;  %p19_p7 = scmp.ge.s32.totalorder %s1038_s15, 4   ;;  %s1177_s18 = smov %s918_s19 }
 0x218   : > { %s1178_s19 = smov %s922_s20  ;;  %s1179_s20 = smov %s1054_s27 }
 0x219   : > { %s1180_s21 = smov %s1038_s15  ;;  %21 = sbr.rel (!%p19_p7) target bundleno = 6 (0x6), region = 93 }
 0x21e   :  { %528 = vsyncpa [#allocation3], 1 }
 0x21f   :  { %530 = vsyncpa [#allocation3 + $0x1], 1 }
 0x220   :  { %531 = vsyncpa [#allocation6], 1 }
 0x221   :  { %532 = vsyncpa [#allocation4], 1 }
 0x222   :  { %534 = vsyncpa [#allocation4 + $0x1], 1 }

</bundles_post_ra>
